<compile_context>
chip_gen: v7x
topology: tpu7x:2x2x1
jax: 0.10.0
libtpu: 0.0.40
codegen_flags: <defaults>
</compile_context>

<pallas_src>
import jax
import jax.numpy as jnp
from jax.experimental import pallas as pl
from jax.experimental.pallas import tpu as pltpu


def _round_up(x, m):
    return ((x + m - 1) // m) * m


def _detect_tensorcores_per_chip():
    """Best-effort TensorCores-per-chip (2 on v7x, 1 on v5e/v6e). Falls back to 1."""
    try:
        dev = jax.devices()[0]
        for attr in ("num_cores", "core_count", "num_cores_per_chip"):
            n = getattr(dev, attr, None)
            if isinstance(n, int) and n > 0:
                return n
    except Exception:
        pass
    return 1


def _pick_block_m(batch, num_tiles):
    """Largest batch tile giving ~num_tiles grid steps, rounded to sublanes (8)."""
    num_tiles = max(1, int(num_tiles))
    bm = -(-batch // num_tiles)            # ceil(batch / num_tiles)
    bm = _round_up(max(bm, 1), 8)
    return min(bm, _round_up(batch, 8))


def _vmem_limit_bytes(block_m, din, h, dout, x_itemsize, w_itemsize, out_itemsize):
    """Actual footprint (resident weights + double-buffered x/out tiles) + margin."""
    weights = 2 * ((din * h + h * dout) * w_itemsize + (h + dout) * 4)
    io_tiles = 2 * block_m * (din * x_itemsize + dout * out_itemsize)
    total = 2 * (weights + io_tiles)       # generous 2x margin for layout padding
    return int(min(100 * 1024 * 1024, max(4 * 1024 * 1024, total)))


def simplenet_kernel(x_ref, w1_ref, b1_ref, w2_ref, b2_ref, out_ref):
    cdt = w1_ref.dtype
    # fc1: (bm, Din) @ (Din, H) -> f32 accumulate on the MXU (K<128 is just
    # an underfilled systolic pass; this kernel is nowhere near MXU-bound).
    h = jnp.dot(x_ref[...].astype(cdt), w1_ref[...],
                preferred_element_type=jnp.float32)
    # bias (f32) + ReLU on the VPU.
    h = jnp.maximum(h + b1_ref[...], 0.0)
    # fc2: (bm, H) @ (H, Dout) -> f32 accumulate.
    o = jnp.dot(h.astype(cdt), w2_ref[...], preferred_element_type=jnp.float32)
    out_ref[...] = (o + b2_ref[...]).astype(out_ref.dtype)


def prepare_params(w1, b1, w2, b2, *, compute_dtype=jnp.bfloat16):
    """One-time parameter preparation (do NOT redo this per forward call).

    Weights are stored pre-transposed as (in, out), equivalent to PyTorch's
    x @ W.T + b with W of shape (out, in). Weights are cast to the MXU compute
    dtype; biases stay f32 and are reshaped to (1, N) for lane-major layout.
    """
    return (w1.astype(compute_dtype),
            b1.astype(jnp.float32).reshape(1, -1),
            w2.astype(compute_dtype),
            b2.astype(jnp.float32).reshape(1, -1))


def simplenet_forward(x, params, *, block_m=None, num_tiles=None):
    """SimpleNet forward: relu(x @ w1 + b1) @ w2 + b2.

    x: (B, Din) in any float dtype (output matches x.dtype).
    params: output of prepare_params (bf16 weights, f32 (1, N) biases).
    """
    w1, b1, w2, b2 = params
    B, Din = x.shape
    H = w1.shape[1]
    Dout = w2.shape[1]

    if block_m is None:
        if num_tiles is None:
            num_tiles = _detect_tensorcores_per_chip()
        block_m = _pick_block_m(B, num_tiles)

    b_p = _round_up(B, block_m)
    num_m = b_p // block_m

    # Only re-materialize x when the batch actually needs padding.
    if b_p != B:
        x_in = jnp.zeros((b_p, Din), x.dtype).at[:B].set(x)
    else:
        x_in = x

    vmem_bytes = _vmem_limit_bytes(block_m, Din, H, Dout,
                                   x.dtype.itemsize, w1.dtype.itemsize,
                                   x.dtype.itemsize)
    # TODO(synk): if (Din*H + H*Dout)*itemsize ever exceeds ~1/3 of v7x's 64 MiB
    # VMEM, switch the resident-weight design to a K/N-tiled "arbitrary" grid
    # axis with an f32 accumulator; irrelevant at these layer sizes.

    out = pl.pallas_call(
        simplenet_kernel,
        out_shape=jax.ShapeDtypeStruct((b_p, Dout), x.dtype),
        grid_spec=pltpu.PrefetchScalarGridSpec(
            num_scalar_prefetch=0,
            grid=(num_m,),
            in_specs=[
                # x tile marches over the batch axis; Din is full-extent.
                pl.BlockSpec((block_m, Din), lambda i: (i, 0)),
                # Weights / biases: constant block index -> resident in VMEM,
                # DMA'd once for the whole call. All dims full-extent.
                pl.BlockSpec((Din, H), lambda i: (0, 0)),
                pl.BlockSpec((1, H), lambda i: (0, 0)),
                pl.BlockSpec((H, Dout), lambda i: (0, 0)),
                pl.BlockSpec((1, Dout), lambda i: (0, 0)),
            ],
            out_specs=pl.BlockSpec((block_m, Dout), lambda i: (i, 0)),
        ),
        compiler_params=pltpu.CompilerParams(
            # Batch tiles are independent -> shard across TCs on v7x;
            # harmless single step on v5e/v6e.
            dimension_semantics=("parallel",),
            vmem_limit_bytes=vmem_bytes,
        ),
    )(x_in, w1, b1, w2, b2)

    return out[:B] if b_p != B else out


def init_params(key, input_size, hidden_size, output_size):
    """Deterministic init mimicking nn.Linear's U(-1/sqrt(fan_in), 1/sqrt(fan_in))."""
    k1, k2, k3, k4 = jax.random.split(key, 4)
    bound1 = 1.0 / jnp.sqrt(input_size)
    bound2 = 1.0 / jnp.sqrt(hidden_size)
    # Stored already transposed: (in, out)
    w1 = jax.random.uniform(k1, (input_size, hidden_size),
                            minval=-bound1, maxval=bound1, dtype=jnp.float32)
    b1 = jax.random.uniform(k2, (hidden_size,),
                            minval=-bound1, maxval=bound1, dtype=jnp.float32)
    w2 = jax.random.uniform(k3, (hidden_size, output_size),
                            minval=-bound2, maxval=bound2, dtype=jnp.float32)
    b2 = jax.random.uniform(k4, (output_size,),
                            minval=-bound2, maxval=bound2, dtype=jnp.float32)
    return w1, b1, w2, b2


if __name__ == "__main__":
    batch = 256
    input_size = 32
    hidden_size = 64
    output_size = 16

    key = jax.random.PRNGKey(0)
    kx, kp = jax.random.split(key)
    x = jax.random.normal(kx, (batch, input_size), dtype=jnp.float32)
    w1, b1, w2, b2 = init_params(kp, input_size, hidden_size, output_size)

    # One-time parameter prep (bf16 cast + bias reshape) outside the call path.
    params = prepare_params(w1, b1, w2, b2)

    out = simplenet_forward(x, params)
    out = jax.block_until_ready(out)
    assert out.shape == (batch, output_size)
    assert out.dtype == x.dtype

    # Reference in plain JAX mimicking the kernel's precision policy:
    # bf16 MXU inputs, f32 accumulation, f32 bias/ReLU, bf16 h into fc2.
    hp = jax.lax.Precision.HIGHEST
    x_c = x.astype(jnp.bfloat16).astype(jnp.float32)
    w1_c = params[0].astype(jnp.float32)
    w2_c = params[2].astype(jnp.float32)
    h_ref = jnp.maximum(jnp.dot(x_c, w1_c, precision=hp) + b1, 0.0)
    h_ref = h_ref.astype(jnp.bfloat16).astype(jnp.float32)
    ref = jnp.dot(h_ref, w2_c, precision=hp) + b2
    assert jnp.allclose(out, ref, atol=2e-3, rtol=2e-3)

    # Sanity check against the full-f32 math of the original PyTorch module.
    ref_f32 = jnp.maximum(x @ w1 + b1, 0.0) @ w2 + b2
    assert jnp.allclose(out, ref_f32, atol=1e-1, rtol=1e-1)

    print("KERNEL_OK")
</pallas_src>

<mosaic_0001>
module attributes {stable_mosaic.version = 11 : i64} {
  func.func @simplenet_kernel(%arg0: i32, %arg1: memref<256x32xf32, #tpu.memory_space<vmem>>, %arg2: memref<32x64xbf16, #tpu.memory_space<vmem>>, %arg3: memref<1x64xf32, #tpu.memory_space<vmem>>, %arg4: memref<64x16xbf16, #tpu.memory_space<vmem>>, %arg5: memref<1x16xf32, #tpu.memory_space<vmem>>, %arg6: memref<256x16xf32, #tpu.memory_space<vmem>>) attributes {dimension_semantics = [#tpu.dimension_semantics<parallel>], iteration_bounds = array<i64: 1>, scalar_prefetch = 0 : i64, scratch_operands = 0 : i64, tpu.core_type = #tpu.core_type<tc>, window_params = [{transform_indices = @transform_0, window_bounds = array<i64: 256, 32>}, {pipeline_mode = #tpu.pipeline_mode<synchronous>, transform_indices = @transform_1, window_bounds = array<i64: 32, 64>}, {pipeline_mode = #tpu.pipeline_mode<synchronous>, transform_indices = @transform_2, window_bounds = array<i64: 1, 64>}, {pipeline_mode = #tpu.pipeline_mode<synchronous>, transform_indices = @transform_3, window_bounds = array<i64: 64, 16>}, {pipeline_mode = #tpu.pipeline_mode<synchronous>, transform_indices = @transform_4, window_bounds = array<i64: 1, 16>}, {transform_indices = @transform_5, window_bounds = array<i64: 256, 16>}]} {
    %c0 = arith.constant 0 : index
    %c0_0 = arith.constant 0 : index
    %0 = vector.load %arg1[%c0, %c0_0] : memref<256x32xf32, #tpu.memory_space<vmem>>, vector<256x32xf32>
    %1 = arith.truncf %0 : vector<256x32xf32> to vector<256x32xbf16>
    %c0_1 = arith.constant 0 : index
    %c0_2 = arith.constant 0 : index
    %2 = vector.load %arg2[%c0_1, %c0_2] : memref<32x64xbf16, #tpu.memory_space<vmem>>, vector<32x64xbf16>
    %cst = arith.constant dense<0.000000e+00> : vector<256x64xf32>
    %3 = tpu.matmul %1, %2, %cst {dimension_numbers = #tpu.dot_dimension_numbers<[1], [0], [0], [1], [0, 0, 1, 1], [], []>} : vector<256x32xbf16>, vector<32x64xbf16>, vector<256x64xf32> -> vector<256x64xf32>
    %c0_3 = arith.constant 0 : index
    %c0_4 = arith.constant 0 : index
    %4 = vector.load %arg3[%c0_3, %c0_4] : memref<1x64xf32, #tpu.memory_space<vmem>>, vector<1x64xf32>
    %5 = vector.broadcast %4 : vector<1x64xf32> to vector<256x64xf32>
    %6 = arith.addf %3, %5 : vector<256x64xf32>
    %cst_5 = arith.constant 0.000000e+00 : f32
    %7 = vector.broadcast %cst_5 : f32 to vector<256x64xf32>
    %8 = arith.maximumf %6, %7 : vector<256x64xf32>
    %9 = arith.truncf %8 : vector<256x64xf32> to vector<256x64xbf16>
    %c0_6 = arith.constant 0 : index
    %c0_7 = arith.constant 0 : index
    %10 = vector.load %arg4[%c0_6, %c0_7] : memref<64x16xbf16, #tpu.memory_space<vmem>>, vector<64x16xbf16>
    %cst_8 = arith.constant dense<0.000000e+00> : vector<256x16xf32>
    %11 = tpu.matmul %9, %10, %cst_8 {dimension_numbers = #tpu.dot_dimension_numbers<[1], [0], [0], [1], [0, 0, 1, 1], [], []>} : vector<256x64xbf16>, vector<64x16xbf16>, vector<256x16xf32> -> vector<256x16xf32>
    %c0_9 = arith.constant 0 : index
    %c0_10 = arith.constant 0 : index
    %12 = vector.load %arg5[%c0_9, %c0_10] : memref<1x16xf32, #tpu.memory_space<vmem>>, vector<1x16xf32>
    %13 = vector.broadcast %12 : vector<1x16xf32> to vector<256x16xf32>
    %14 = arith.addf %11, %13 : vector<256x16xf32>
    %c0_11 = arith.constant 0 : index
    %c0_12 = arith.constant 0 : index
    %15 = vector.load %arg6[%c0_11, %c0_12] : memref<256x16xf32, #tpu.memory_space<vmem>>, vector<256x16xf32>
    tpu.vector_store %arg6[%c0_11, %c0_12], %14 {strides = array<i32>} : memref<256x16xf32, #tpu.memory_space<vmem>>, vector<256x16xf32>,
    return
  }
  func.func @transform_0(%arg0: i32) -> (i32, i32) {
    %c0_i32 = arith.constant 0 : i32
    %c0_i32_0 = arith.constant 0 : i32
    return %arg0, %c0_i32 : i32, i32
  }
  func.func @transform_1(%arg0: i32) -> (i32, i32) {
    %c0_i32 = arith.constant 0 : i32
    %c0_i32_0 = arith.constant 0 : i32
    %c0_i32_1 = arith.constant 0 : i32
    return %c0_i32, %c0_i32_0 : i32, i32
  }
  func.func @transform_2(%arg0: i32) -> (i32, i32) {
    %c0_i32 = arith.constant 0 : i32
    %c0_i32_0 = arith.constant 0 : i32
    %c0_i32_1 = arith.constant 0 : i32
    return %c0_i32, %c0_i32_0 : i32, i32
  }
  func.func @transform_3(%arg0: i32) -> (i32, i32) {
    %c0_i32 = arith.constant 0 : i32
    %c0_i32_0 = arith.constant 0 : i32
    %c0_i32_1 = arith.constant 0 : i32
    return %c0_i32, %c0_i32_0 : i32, i32
  }
  func.func @transform_4(%arg0: i32) -> (i32, i32) {
    %c0_i32 = arith.constant 0 : i32
    %c0_i32_0 = arith.constant 0 : i32
    %c0_i32_1 = arith.constant 0 : i32
    return %c0_i32, %c0_i32_0 : i32, i32
  }
  func.func @transform_5(%arg0: i32) -> (i32, i32) {
    %c0_i32 = arith.constant 0 : i32
    %c0_i32_0 = arith.constant 0 : i32
    return %arg0, %c0_i32 : i32, i32
  }
}

</mosaic_0001>

<bundles_post_ra>
// kernel: tpu_custom_call.1
= control target key start
LH: loop header
LB: loop body
LE: loop exit
PB: predicated region body
PF: predicated region fallthrough
CT: control target
= control target key end

     0   :  { %vm92_vm0 = vcmask 261120   ;;  %vm389_vm1 = vcmask 523264   ;;  %vm599_vm2 = vcmask 130048   ;;  %s1174_s1 = inlined_call_operand.vmem [shape: bf16[32,64], index: 1, kind: input, shape index: {}]   ;;  %s1175_s0 = inlined_call_operand.vmem [shape: f32[256,32], index: 0, kind: input, shape index: {}]   ;;  %s1176_s3 = inlined_call_operand.vmem [shape: bf16[64,16], index: 3, kind: input, shape index: {}]   ;;  %s1177_s2 = inlined_call_operand.vmem [shape: f32[1,64], index: 2, kind: input, shape index: {}]   ;;  %s1178_s4 = inlined_call_operand.vmem [shape: f32[1,16], index: 4, kind: input, shape index: {}]   ;;  %s1179_s5 = inlined_call_operand.vmem [shape: f32[256,16], index: 5, kind: output, shape index: {}]  }
   0x1   :  { %v790_v0 = vld [vmem:[%s1174_s1] sm:$0xff]   ;;  %v791_v1 = vld [vmem:[%s1174_s1 + $0x8] sm:$0xff]   ;;  %v23_v5 = vld [vmem:[%s1175_s0 + $0x10] sm:$0xff] }
   0x2   :  { %714 = vmatprep.subr.bf16.mxu0 %v790_v0  ;;  %v21_v2 = vld [vmem:[%s1175_s0] sm:$0xff]  ;;  %v22_v3 = vld [vmem:[%s1175_s0 + $0x8] sm:$0xff]  ;;  %v24_v6 = vld [vmem:[%s1175_s0 + $0x18] sm:$0xff] }
   0x3   :  { %715 = vmatpush3.bf16.msra.mxu0 %v790_v0  ;;  %v53_v4 = vpack.c.bf16 %v22_v3, %v21_v2  ;;  %v25_v7 = vld [vmem:[%s1175_s0 + $0x20] sm:$0xff]  ;;  %v26_v8 = vld [vmem:[%s1175_s0 + $0x28] sm:$0xff]  ;;  %v54_v9 = vpack.c.bf16 %v24_v6, %v23_v5  ;;  %v27_v11 = vld [vmem:[%s1175_s0 + $0x30] sm:$0xff] }
   0x4   :  { %716 = vmatprep.subr.bf16.mxu0 %v791_v1  ;;  %v55_v10 = vpack.c.bf16 %v26_v8, %v25_v7  ;;  %v28_v12 = vld [vmem:[%s1175_s0 + $0x38] sm:$0xff]  ;;  %v29_v13 = vld [vmem:[%s1175_s0 + $0x40] sm:$0xff]  ;;  %v30_v14 = vld [vmem:[%s1175_s0 + $0x48] sm:$0xff] }
   0x5   :  { %718 = vmatprep.mubr.msk.bf16.mxu0 %vm92_vm0, %v53_v4  ;;  %v792_v15 = vld [vmem:[%s1176_s3] sm:$0xff]   ;;  %v56_v16 = vpack.c.bf16 %v28_v12, %v27_v11  ;;  %v793_v17 = vld [vmem:[%s1176_s3 + $0x8] sm:$0xff]   ;;  %v57_v18 = vpack.c.bf16 %v30_v14, %v29_v13  ;;  %v31_v19 = vld [vmem:[%s1175_s0 + $0x50] sm:$0xff] }
   0x6   :  { %750 = vmatprep.subr.bf16.mxu1 %v792_v15  ;;  %v32_v20 = vld [vmem:[%s1175_s0 + $0x58] sm:$0xff]  ;;  %v33_v21 = vld [vmem:[%s1175_s0 + $0x60] sm:$0xff]  ;;  %v34_v22 = vld [vmem:[%s1175_s0 + $0x68] sm:$0xff] }
   0x7   :  { %717 = vmatpush3.bf16.msra.mxu0 %v791_v1  ;;  %751 = vmatpush3.bf16.msra.mxu1 %v792_v15  ;;  %v58_v23 = vpack.c.bf16 %v32_v20, %v31_v19  ;;  %v59_v24 = vpack.c.bf16 %v34_v22, %v33_v21  ;;  %v35_v25 = vld [vmem:[%s1175_s0 + $0x70] sm:$0xff]  ;;  %v36_v26 = vld [vmem:[%s1175_s0 + $0x78] sm:$0xff]  ;;  %v37_v27 = vld [vmem:[%s1175_s0 + $0x80] sm:$0xff] }
   0x8   :  { %752 = vmatprep.subr.bf16.mxu1 %v793_v17  ;;  %v38_v28 = vld [vmem:[%s1175_s0 + $0x88] sm:$0xff]  ;;  %v60_v29 = vpack.c.bf16 %v36_v26, %v35_v25  ;;  %v39_v31 = vld [vmem:[%s1175_s0 + $0x90] sm:$0xff]  ;;  %v40_v32 = vld [vmem:[%s1175_s0 + $0x98] sm:$0xff] }
   0x9   :  { %v61_v30 = vpack.c.bf16 %v38_v28, %v37_v27  ;;  %v41_v33 = vld [vmem:[%s1175_s0 + $0xa0] sm:$0xff]  ;;  %v42_v34 = vld [vmem:[%s1175_s0 + $0xa8] sm:$0xff]  ;;  %v62_v35 = vpack.c.bf16 %v40_v32, %v39_v31  ;;  %v43_v37 = vld [vmem:[%s1175_s0 + $0xb0] sm:$0xff] }
   0xa   :  { %719 = vmatmul.mubr.msk.bf16.vlgmr.msra.gmra.mrb[0].mxu0 %vm92_vm0, %v54_v9  ;;  %v63_v36 = vpack.c.bf16 %v42_v34, %v41_v33  ;;  %v44_v38 = vld [vmem:[%s1175_s0 + $0xb8] sm:$0xff]  ;;  %v45_v39 = vld [vmem:[%s1175_s0 + $0xc0] sm:$0xff]  ;;  %v46_v40 = vld [vmem:[%s1175_s0 + $0xc8] sm:$0xff] }
   0xb   :  { %722 = vmatprep.mubr.msk.bf16.mxu0 %vm92_vm0, %v55_v10  ;;  %753 = vmatpush3.bf16.msra.mxu1 %v793_v17  ;;  %v64_v41 = vpack.c.bf16 %v44_v38, %v43_v37  ;;  %v65_v42 = vpack.c.bf16 %v46_v40, %v45_v39  ;;  %v47_v43 = vld [vmem:[%s1175_s0 + $0xd0] sm:$0xff]  ;;  %v48_v44 = vld [vmem:[%s1175_s0 + $0xd8] sm:$0xff]  ;;  %v49_v45 = vld [vmem:[%s1175_s0 + $0xe0] sm:$0xff] }
   0xc   :  { %v50_v46 = vld [vmem:[%s1175_s0 + $0xe8] sm:$0xff]  ;;  %v66_v47 = vpack.c.bf16 %v48_v44, %v47_v43  ;;  %v51_v49 = vld [vmem:[%s1175_s0 + $0xf0] sm:$0xff]  ;;  %v52_v50 = vld [vmem:[%s1175_s0 + $0xf8] sm:$0xff] }
   0xd   :  { %v67_v48 = vpack.c.bf16 %v50_v46, %v49_v45  ;;  %v68_v51 = vpack.c.bf16 %v52_v50, %v51_v49  ;;  %v794_v52 = vld [vmem:[%s1176_s3 + $0x10] sm:$0xff]   ;;  %v795_v53 = vld [vmem:[%s1176_s3 + $0x18] sm:$0xff]   ;;  %v959_v54 = vld [vmem:[%s1177_s2] ss:$0 sm:$0xff] }
   0xe   :  { %754 = vmatprep.subr.bf16.mxu1 %v794_v52 }
   0xf   :  { %755 = vmatpush3.bf16.msra.mxu1 %v794_v52 }
  0x10   :  { %756 = vmatprep.subr.bf16.mxu1 %v795_v53 }
  0x12   :  { %723 = vmatmul.mubr.msk.bf16.gmra.mrb[4].mxu0 %vm92_vm0, %v56_v16 }
  0x13   :  { %726 = vmatprep.mubr.msk.bf16.mxu0 %vm92_vm0, %v57_v18  ;;  %757 = vmatpush3.bf16.msra.mxu1 %v795_v53 }
  0x1a   :  { %727 = vmatmul.mubr.msk.bf16.gmra.mrb[8].mxu0 %vm92_vm0, %v58_v23 }
  0x1b   :  { %730 = vmatprep.mubr.msk.bf16.mxu0 %vm92_vm0, %v59_v24 }
  0x22   :  { %731 = vmatmul.mubr.msk.bf16.gmra.mrb[12].mxu0 %vm92_vm0, %v60_v29 }
  0x23   :  { %734 = vmatprep.mubr.msk.bf16.mxu0 %vm92_vm0, %v61_v30 }
  0x2a   :  { %735 = vmatmul.mubr.msk.bf16.gmra.mrb[16].mxu0 %vm92_vm0, %v62_v35 }
  0x2b   :  { %738 = vmatprep.mubr.msk.bf16.mxu0 %vm92_vm0, %v63_v36 }
  0x32   :  { %739 = vmatmul.mubr.msk.bf16.gmra.mrb[20].mxu0 %vm92_vm0, %v64_v41 }
  0x33   :  { %742 = vmatprep.mubr.msk.bf16.mxu0 %vm92_vm0, %v65_v42 }
  0x3a   :  { %743 = vmatmul.mubr.msk.bf16.gmra.mrb[24].mxu0 %vm92_vm0, %v66_v47 }
  0x3b   :  { %746 = vmatprep.mubr.msk.bf16.mxu0 %vm92_vm0, %v67_v48 }
  0x42   :  { %747 = vmatmul.mubr.msk.bf16.gmra.mrb[28].mxu0 %vm92_vm0, %v68_v51 }
  0xdd   :  { %v720_v55 = vpop.f32.mrb[0].mxu0 }
  0xde   :  { %v184_v56 = vadd.f32 %v720_v55, %v959_v54  ;;  %v175_v57 = vpop.f32.mrb[1].mxu0 }
  0xdf   :  { %v176_v58 = vadd.f32 %v959_v54, %v175_v57  ;;  %v721_v59 = vpop.f32.mrb[2].mxu0 }
  0xe0   :  { %v187_v60 = vadd.f32 %v721_v59, %v959_v54  ;;  %v178_v61 = vpop.f32.mrb[3].mxu0  ;;  %v304_v63 = vmax.f32 %v184_v56, 0.0 }
  0xe1   :  { %v179_v62 = vadd.f32 %v959_v54, %v178_v61  ;;  %v302_v1 = vmax.f32 %v176_v58, 0.0 }
  0xe2   :  { %v305_v0 = vmax.f32 %v187_v60, 0.0 }
  0xe3   :  { %v303_v2 = vmax.f32 %v179_v62, 0.0 }
  0xe4   :  { %v335_v3 = vpack.c.bf16 %v305_v0, %v304_v63 }
  0xe5   :  { %v724_v4 = vpop.f32.mrb[4].mxu0  ;;  %v334_v5 = vpack.c.bf16 %v303_v2, %v302_v1 }
  0xe6   :  { %v200_v6 = vadd.f32 %v724_v4, %v959_v54  ;;  %v191_v7 = vpop.f32.mrb[5].mxu0 }
  0xe7   :  { %v192_v8 = vadd.f32 %v959_v54, %v191_v7  ;;  %v725_v9 = vpop.f32.mrb[6].mxu0  ;;  %758 = vmatprep.mubr.msk.bf16.mxu1 %vm389_vm1, %v334_v5 }
  0xe8   :  { %v203_v10 = vadd.f32 %v725_v9, %v959_v54  ;;  %v194_v11 = vpop.f32.mrb[7].mxu0  ;;  %759 = vmatmul.mubr.msk.bf16.vlgmr.msra.gmra.mrb[0].mxu1 %vm389_vm1, %v335_v3  ;;  %v308_v13 = vmax.f32 %v200_v6, 0.0 }
  0xe9   :  { %v195_v12 = vadd.f32 %v959_v54, %v194_v11  ;;  %v306_v15 = vmax.f32 %v192_v8, 0.0 }
  0xea   :  { %v309_v14 = vmax.f32 %v203_v10, 0.0 }
  0xeb   :  { %v307_v16 = vmax.f32 %v195_v12, 0.0 }
  0xec   :  { %v337_v17 = vpack.c.bf16 %v309_v14, %v308_v13 }
  0xed   :  { %v336_v18 = vpack.c.bf16 %v307_v16, %v306_v15  ;;  %v728_v19 = vpop.f32.mrb[8].mxu0 }
  0xee   :  { %v216_v20 = vadd.f32 %v728_v19, %v959_v54  ;;  %v207_v21 = vpop.f32.mrb[9].mxu0 }
  0xef   :  { %v208_v22 = vadd.f32 %v959_v54, %v207_v21  ;;  %v729_v23 = vpop.f32.mrb[10].mxu0  ;;  %762 = vmatprep.mubr.msk.bf16.mxu1 %vm389_vm1, %v336_v18 }
  0xf0   :  { %v219_v24 = vadd.f32 %v729_v23, %v959_v54  ;;  %v210_v25 = vpop.f32.mrb[11].mxu0  ;;  %763 = vmatmul.mubr.msk.bf16.gmra.mrb[4].mxu1 %vm389_vm1, %v337_v17  ;;  %v312_v27 = vmax.f32 %v216_v20, 0.0 }
  0xf1   :  { %v211_v26 = vadd.f32 %v959_v54, %v210_v25  ;;  %v310_v29 = vmax.f32 %v208_v22, 0.0 }
  0xf2   :  { %v313_v28 = vmax.f32 %v219_v24, 0.0 }
  0xf3   :  { %v311_v30 = vmax.f32 %v211_v26, 0.0 }
  0xf4   :  { %v339_v31 = vpack.c.bf16 %v313_v28, %v312_v27 }
  0xf5   :  { %v338_v32 = vpack.c.bf16 %v311_v30, %v310_v29  ;;  %v732_v33 = vpop.f32.mrb[12].mxu0 }
  0xf6   :  { %v232_v34 = vadd.f32 %v732_v33, %v959_v54  ;;  %v223_v35 = vpop.f32.mrb[13].mxu0 }
  0xf7   :  { %v224_v36 = vadd.f32 %v959_v54, %v223_v35  ;;  %v733_v37 = vpop.f32.mrb[14].mxu0  ;;  %766 = vmatprep.mubr.msk.bf16.mxu1 %vm389_vm1, %v338_v32 }
  0xf8   :  { %v235_v38 = vadd.f32 %v733_v37, %v959_v54  ;;  %v226_v39 = vpop.f32.mrb[15].mxu0  ;;  %767 = vmatmul.mubr.msk.bf16.gmra.mrb[8].mxu1 %vm389_vm1, %v339_v31  ;;  %v316_v41 = vmax.f32 %v232_v34, 0.0 }
  0xf9   :  { %v227_v40 = vadd.f32 %v959_v54, %v226_v39  ;;  %v314_v43 = vmax.f32 %v224_v36, 0.0 }
  0xfa   :  { %v317_v42 = vmax.f32 %v235_v38, 0.0 }
  0xfb   :  { %v315_v44 = vmax.f32 %v227_v40, 0.0  ;;  %v1012_v40 = vld [vmem:[%s1178_s4] ss:$0 sm:$0xff] }
  0xfc   :  { %v341_v45 = vpack.c.bf16 %v317_v42, %v316_v41 }
  0xfd   :  { %v340_v46 = vpack.c.bf16 %v315_v44, %v314_v43  ;;  %v736_v47 = vpop.f32.mrb[16].mxu0 }
  0xfe   :  { %v248_v48 = vadd.f32 %v736_v47, %v959_v54  ;;  %v239_v49 = vpop.f32.mrb[17].mxu0 }
  0xff   :  { %v240_v50 = vadd.f32 %v959_v54, %v239_v49  ;;  %v737_v51 = vpop.f32.mrb[18].mxu0  ;;  %770 = vmatprep.mubr.msk.bf16.mxu1 %vm389_vm1, %v340_v46 }
 0x100   :  { %v251_v52 = vadd.f32 %v737_v51, %v959_v54  ;;  %v242_v53 = vpop.f32.mrb[19].mxu0  ;;  %771 = vmatmul.mubr.msk.bf16.gmra.mrb[12].mxu1 %vm389_vm1, %v341_v45  ;;  %v320_v56 = vmax.f32 %v248_v48, 0.0 }
 0x101   :  { %v243_v55 = vadd.f32 %v959_v54, %v242_v53  ;;  %v318_v58 = vmax.f32 %v240_v50, 0.0 }
 0x102   :  { %v321_v57 = vmax.f32 %v251_v52, 0.0 }
 0x103   :  { %v319_v59 = vmax.f32 %v243_v55, 0.0 }
 0x104   :  { %v343_v60 = vpack.c.bf16 %v321_v57, %v320_v56 }
 0x105   :  { %v342_v61 = vpack.c.bf16 %v319_v59, %v318_v58  ;;  %v740_v62 = vpop.f32.mrb[20].mxu0 }
 0x106   :  { %v264_v63 = vadd.f32 %v740_v62, %v959_v54  ;;  %v255_v0 = vpop.f32.mrb[21].mxu0 }
 0x107   :  { %v256_v1 = vadd.f32 %v959_v54, %v255_v0  ;;  %v741_v2 = vpop.f32.mrb[22].mxu0  ;;  %774 = vmatprep.mubr.msk.bf16.mxu1 %vm389_vm1, %v342_v61 }
 0x108   :  { %v267_v3 = vadd.f32 %v741_v2, %v959_v54  ;;  %v258_v4 = vpop.f32.mrb[23].mxu0  ;;  %775 = vmatmul.mubr.msk.bf16.gmra.mrb[16].mxu1 %vm389_vm1, %v343_v60  ;;  %v324_v6 = vmax.f32 %v264_v63, 0.0 }
 0x109   :  { %v259_v5 = vadd.f32 %v959_v54, %v258_v4  ;;  %v322_v8 = vmax.f32 %v256_v1, 0.0 }
 0x10a   :  { %v325_v7 = vmax.f32 %v267_v3, 0.0 }
 0x10b   :  { %v323_v9 = vmax.f32 %v259_v5, 0.0 }
 0x10c   :  { %v345_v10 = vpack.c.bf16 %v325_v7, %v324_v6 }
 0x10d   :  { %v344_v11 = vpack.c.bf16 %v323_v9, %v322_v8  ;;  %v744_v12 = vpop.f32.mrb[24].mxu0 }
 0x10e   :  { %v280_v13 = vadd.f32 %v744_v12, %v959_v54  ;;  %v271_v14 = vpop.f32.mrb[25].mxu0 }
 0x10f   :  { %v272_v15 = vadd.f32 %v959_v54, %v271_v14  ;;  %v745_v16 = vpop.f32.mrb[26].mxu0  ;;  %778 = vmatprep.mubr.msk.bf16.mxu1 %vm389_vm1, %v344_v11 }
 0x110   :  { %v283_v17 = vadd.f32 %v745_v16, %v959_v54  ;;  %v274_v18 = vpop.f32.mrb[27].mxu0  ;;  %779 = vmatmul.mubr.msk.bf16.gmra.mrb[20].mxu1 %vm389_vm1, %v345_v10  ;;  %v328_v20 = vmax.f32 %v280_v13, 0.0 }
 0x111   :  { %v275_v19 = vadd.f32 %v959_v54, %v274_v18  ;;  %v326_v22 = vmax.f32 %v272_v15, 0.0 }
 0x112   :  { %v329_v21 = vmax.f32 %v283_v17, 0.0 }
 0x113   :  { %v327_v23 = vmax.f32 %v275_v19, 0.0 }
 0x114   :  { %v347_v24 = vpack.c.bf16 %v329_v21, %v328_v20 }
 0x115   :  { %v346_v25 = vpack.c.bf16 %v327_v23, %v326_v22  ;;  %v748_v26 = vpop.f32.mrb[28].mxu0 }
 0x116   :  { %v296_v27 = vadd.f32 %v748_v26, %v959_v54  ;;  %v287_v28 = vpop.f32.mrb[29].mxu0 }
 0x117   :  { %v288_v29 = vadd.f32 %v959_v54, %v287_v28  ;;  %v749_v30 = vpop.f32.mrb[30].mxu0  ;;  %782 = vmatprep.mubr.msk.bf16.mxu1 %vm389_vm1, %v346_v25 }
 0x118   :  { %v299_v31 = vadd.f32 %v749_v30, %v959_v54  ;;  %v290_v32 = vpop.f32.mrb[31].mxu0  ;;  %783 = vmatmul.mubr.msk.bf16.gmra.mrb[24].mxu1 %vm389_vm1, %v347_v24  ;;  %v332_v34 = vmax.f32 %v296_v27, 0.0 }
 0x119   :  { %v291_v33 = vadd.f32 %v959_v54, %v290_v32  ;;  %v330_v36 = vmax.f32 %v288_v29, 0.0 }
 0x11a   :  { %v333_v35 = vmax.f32 %v299_v31, 0.0 }
 0x11b   :  { %v331_v37 = vmax.f32 %v291_v33, 0.0 }
 0x11c   :  { %v349_v38 = vpack.c.bf16 %v333_v35, %v332_v34 }
 0x11d   :  { %v348_v39 = vpack.c.bf16 %v331_v37, %v330_v36 }
 0x11f   :  { %786 = vmatprep.mubr.msk.bf16.mxu1 %vm389_vm1, %v348_v39 }
 0x120   :  { %787 = vmatmul.mubr.msk.bf16.gmra.mrb[28].mxu1 %vm389_vm1, %v349_v38 }
 0x1bb   :  { %v760_v41 = vpop.f32.mrb[0].mxu1 }
 0x1bc   :  { %v481_v42 = vadd.f32 %v760_v41, %v1012_v40  ;;  %v472_v54 = vpop.f32.mrb[1].mxu1 }
 0x1bd   :  { %v473_v43 = vadd.f32 %v1012_v40, %v472_v54  ;;  %v761_v44 = vpop.f32.mrb[2].mxu1 }
 0x1be   :  { %602 = vst.msk [vmem:[%s1179_s5 + $0x10] sm:$0xff] %vm599_vm2, %v481_v42  ;;  %v484_v45 = vadd.f32 %v761_v44, %v1012_v40  ;;  %v475_v46 = vpop.f32.mrb[3].mxu1 }
 0x1bf   :  { %600 = vst.msk [vmem:[%s1179_s5] sm:$0xff] %vm599_vm2, %v473_v43  ;;  %v476_v47 = vadd.f32 %v1012_v40, %v475_v46 }
 0x1c0   :  { %603 = vst.msk [vmem:[%s1179_s5 + $0x18] sm:$0xff] %vm599_vm2, %v484_v45 }
 0x1c1   :  { %601 = vst.msk [vmem:[%s1179_s5 + $0x8] sm:$0xff] %vm599_vm2, %v476_v47 }
 0x1c3   :  { %v764_v48 = vpop.f32.mrb[4].mxu1 }
 0x1c4   :  { %v497_v49 = vadd.f32 %v764_v48, %v1012_v40  ;;  %v488_v50 = vpop.f32.mrb[5].mxu1 }
 0x1c5   :  { %v489_v51 = vadd.f32 %v1012_v40, %v488_v50  ;;  %v765_v52 = vpop.f32.mrb[6].mxu1 }
 0x1c6   :  { %606 = vst.msk [vmem:[%s1179_s5 + $0x30] sm:$0xff] %vm599_vm2, %v497_v49  ;;  %v500_v53 = vadd.f32 %v765_v52, %v1012_v40  ;;  %v491_v55 = vpop.f32.mrb[7].mxu1 }
 0x1c7   :  { %604 = vst.msk [vmem:[%s1179_s5 + $0x20] sm:$0xff] %vm599_vm2, %v489_v51  ;;  %v492_v56 = vadd.f32 %v1012_v40, %v491_v55 }
 0x1c8   :  { %607 = vst.msk [vmem:[%s1179_s5 + $0x38] sm:$0xff] %vm599_vm2, %v500_v53 }
 0x1c9   :  { %605 = vst.msk [vmem:[%s1179_s5 + $0x28] sm:$0xff] %vm599_vm2, %v492_v56 }
 0x1cb   :  { %v768_v57 = vpop.f32.mrb[8].mxu1 }
 0x1cc   :  { %v513_v58 = vadd.f32 %v768_v57, %v1012_v40  ;;  %v504_v59 = vpop.f32.mrb[9].mxu1 }
 0x1cd   :  { %v505_v60 = vadd.f32 %v1012_v40, %v504_v59  ;;  %v769_v61 = vpop.f32.mrb[10].mxu1 }
 0x1ce   :  { %610 = vst.msk [vmem:[%s1179_s5 + $0x50] sm:$0xff] %vm599_vm2, %v513_v58  ;;  %v516_v62 = vadd.f32 %v769_v61, %v1012_v40  ;;  %v507_v63 = vpop.f32.mrb[11].mxu1 }
 0x1cf   :  { %608 = vst.msk [vmem:[%s1179_s5 + $0x40] sm:$0xff] %vm599_vm2, %v505_v60  ;;  %v508_v0 = vadd.f32 %v1012_v40, %v507_v63 }
 0x1d0   :  { %611 = vst.msk [vmem:[%s1179_s5 + $0x58] sm:$0xff] %vm599_vm2, %v516_v62 }
 0x1d1   :  { %609 = vst.msk [vmem:[%s1179_s5 + $0x48] sm:$0xff] %vm599_vm2, %v508_v0 }
 0x1d3   :  { %v772_v1 = vpop.f32.mrb[12].mxu1 }
 0x1d4   :  { %v529_v2 = vadd.f32 %v772_v1, %v1012_v40  ;;  %v520_v3 = vpop.f32.mrb[13].mxu1 }
 0x1d5   :  { %v521_v4 = vadd.f32 %v1012_v40, %v520_v3  ;;  %v773_v5 = vpop.f32.mrb[14].mxu1 }
 0x1d6   :  { %614 = vst.msk [vmem:[%s1179_s5 + $0x70] sm:$0xff] %vm599_vm2, %v529_v2  ;;  %v532_v6 = vadd.f32 %v773_v5, %v1012_v40  ;;  %v523_v7 = vpop.f32.mrb[15].mxu1 }
 0x1d7   :  { %612 = vst.msk [vmem:[%s1179_s5 + $0x60] sm:$0xff] %vm599_vm2, %v521_v4  ;;  %v524_v8 = vadd.f32 %v1012_v40, %v523_v7 }
 0x1d8   :  { %615 = vst.msk [vmem:[%s1179_s5 + $0x78] sm:$0xff] %vm599_vm2, %v532_v6 }
 0x1d9   :  { %613 = vst.msk [vmem:[%s1179_s5 + $0x68] sm:$0xff] %vm599_vm2, %v524_v8 }
 0x1db   :  { %v776_v9 = vpop.f32.mrb[16].mxu1 }
 0x1dc   :  { %v545_v10 = vadd.f32 %v776_v9, %v1012_v40  ;;  %v536_v11 = vpop.f32.mrb[17].mxu1 }
 0x1dd   :  { %v537_v12 = vadd.f32 %v1012_v40, %v536_v11  ;;  %v777_v13 = vpop.f32.mrb[18].mxu1 }
 0x1de   :  { %618 = vst.msk [vmem:[%s1179_s5 + $0x90] sm:$0xff] %vm599_vm2, %v545_v10  ;;  %v548_v14 = vadd.f32 %v777_v13, %v1012_v40  ;;  %v539_v15 = vpop.f32.mrb[19].mxu1 }
 0x1df   :  { %616 = vst.msk [vmem:[%s1179_s5 + $0x80] sm:$0xff] %vm599_vm2, %v537_v12  ;;  %v540_v16 = vadd.f32 %v1012_v40, %v539_v15 }
 0x1e0   :  { %619 = vst.msk [vmem:[%s1179_s5 + $0x98] sm:$0xff] %vm599_vm2, %v548_v14 }
 0x1e1   :  { %617 = vst.msk [vmem:[%s1179_s5 + $0x88] sm:$0xff] %vm599_vm2, %v540_v16 }
 0x1e3   :  { %v780_v17 = vpop.f32.mrb[20].mxu1 }
 0x1e4   :  { %v561_v18 = vadd.f32 %v780_v17, %v1012_v40  ;;  %v552_v19 = vpop.f32.mrb[21].mxu1 }
 0x1e5   :  { %v553_v20 = vadd.f32 %v1012_v40, %v552_v19  ;;  %v781_v21 = vpop.f32.mrb[22].mxu1 }
 0x1e6   :  { %622 = vst.msk [vmem:[%s1179_s5 + $0xb0] sm:$0xff] %vm599_vm2, %v561_v18  ;;  %v564_v22 = vadd.f32 %v781_v21, %v1012_v40  ;;  %v555_v23 = vpop.f32.mrb[23].mxu1 }
 0x1e7   :  { %620 = vst.msk [vmem:[%s1179_s5 + $0xa0] sm:$0xff] %vm599_vm2, %v553_v20  ;;  %v556_v24 = vadd.f32 %v1012_v40, %v555_v23 }
 0x1e8   :  { %623 = vst.msk [vmem:[%s1179_s5 + $0xb8] sm:$0xff] %vm599_vm2, %v564_v22 }
 0x1e9   :  { %621 = vst.msk [vmem:[%s1179_s5 + $0xa8] sm:$0xff] %vm599_vm2, %v556_v24 }
 0x1eb   :  { %v784_v25 = vpop.f32.mrb[24].mxu1 }
 0x1ec   :  { %v577_v26 = vadd.f32 %v784_v25, %v1012_v40  ;;  %v568_v27 = vpop.f32.mrb[25].mxu1 }
 0x1ed   :  { %v569_v28 = vadd.f32 %v1012_v40, %v568_v27  ;;  %v785_v29 = vpop.f32.mrb[26].mxu1 }
 0x1ee   :  { %626 = vst.msk [vmem:[%s1179_s5 + $0xd0] sm:$0xff] %vm599_vm2, %v577_v26  ;;  %v580_v30 = vadd.f32 %v785_v29, %v1012_v40  ;;  %v571_v31 = vpop.f32.mrb[27].mxu1 }
 0x1ef   :  { %624 = vst.msk [vmem:[%s1179_s5 + $0xc0] sm:$0xff] %vm599_vm2, %v569_v28  ;;  %v572_v32 = vadd.f32 %v1012_v40, %v571_v31 }
 0x1f0   :  { %627 = vst.msk [vmem:[%s1179_s5 + $0xd8] sm:$0xff] %vm599_vm2, %v580_v30 }
 0x1f1   :  { %625 = vst.msk [vmem:[%s1179_s5 + $0xc8] sm:$0xff] %vm599_vm2, %v572_v32 }
 0x1f3   :  { %v788_v33 = vpop.f32.mrb[28].mxu1 }
 0x1f4   :  { %v593_v34 = vadd.f32 %v788_v33, %v1012_v40  ;;  %v584_v35 = vpop.f32.mrb[29].mxu1 }
 0x1f5   :  { %v585_v36 = vadd.f32 %v1012_v40, %v584_v35  ;;  %v789_v37 = vpop.f32.mrb[30].mxu1 }
 0x1f6   :  { %630 = vst.msk [vmem:[%s1179_s5 + $0xf0] sm:$0xff] %vm599_vm2, %v593_v34  ;;  %v596_v38 = vadd.f32 %v789_v37, %v1012_v40  ;;  %v587_v39 = vpop.f32.mrb[31].mxu1 }
 0x1f7   :  { %628 = vst.msk [vmem:[%s1179_s5 + $0xe0] sm:$0xff] %vm599_vm2, %v585_v36  ;;  %v588_v41 = vadd.f32 %v1012_v40, %v587_v39 }
 0x1f8   :  { %631 = vst.msk [vmem:[%s1179_s5 + $0xf8] sm:$0xff] %vm599_vm2, %v596_v38 }
 0x1f9   :  { %629 = vst.msk [vmem:[%s1179_s5 + $0xe8] sm:$0xff] %vm599_vm2, %v588_v41 }

</bundles_post_ra>
